<compile_context>
chip_gen: v5e
topology: v5e:2x2
jax: 0.10.0
libtpu: 0.0.40
codegen_flags: <defaults>
</compile_context>

<pallas_src>
import jax
import jax.numpy as jnp
from jax.experimental import pallas as pl
from jax.experimental.pallas import tpu as pltpu

LANE = 128
SUBLANE = 8
NEG_SLOPE = 0.01  # nn.LeakyReLU default negative_slope


def _round_up(x, m):
    return (x + m - 1) // m * m


# ----------------------------- Pallas kernel -------------------------------
def _autoencoder_kernel(x_ref,
                        w1_ref, s1_ref, t1_ref,
                        w2_ref, s2_ref, t2_ref,
                        w3_ref, s3_ref, t3_ref,
                        w4_ref, b4_ref,
                        o_ref):
    """Fused 5-layer autoencoder forward for one batch tile (all in VMEM)."""
    x = x_ref[...]

    # Encoder layer 1: block-diag [enc_rna | enc_pro]
    #   Linear(no bias) -> LeakyReLU -> BN(eval, folded affine)
    h = jnp.dot(x, w1_ref[...], preferred_element_type=jnp.float32)
    h = jnp.where(h >= 0.0, h, NEG_SLOPE * h)
    h = h * s1_ref[...] + t1_ref[...]

    # Encoder layer 2 (hidden -> z_dim)
    z = jnp.dot(h, w2_ref[...], preferred_element_type=jnp.float32)
    z = jnp.where(z >= 0.0, z, NEG_SLOPE * z)
    z = z * s2_ref[...] + t2_ref[...]

    # Decoder layer 1 (z_dim -> hidden)
    d = jnp.dot(z, w3_ref[...], preferred_element_type=jnp.float32)
    d = jnp.where(d >= 0.0, d, NEG_SLOPE * d)
    d = d * s3_ref[...] + t3_ref[...]

    # Decoder layer 2: Linear with bias, no activation, no BN
    y = jnp.dot(d, w4_ref[...], preferred_element_type=jnp.float32)
    o_ref[...] = (y + b4_ref[...]).astype(o_ref.dtype)


_PARAM_ORDER = ("w1", "s1", "t1", "w2", "s2", "t2",
                "w3", "s3", "t3", "w4", "b4")


def autoencoder_forward(x, params, *, tile_b=256):
    """x: [B, nfeatures_rna + nfeatures_pro] f32 -> [B, same] f32."""
    n_features = params["n_features"]
    B = x.shape[0]
    K_pad = params["w1"].shape[0]     # padded input feature dim
    O_pad = params["w4"].shape[1]     # padded output feature dim

    # Batch tiling: pad batch to a multiple of the tile (tile itself is a
    # multiple of 8 sublanes). Small demo batches collapse to a single tile.
    tile_b = min(tile_b, _round_up(B, SUBLANE))
    tile_b = _round_up(tile_b, SUBLANE)
    B_pad = _round_up(B, tile_b)

    # Zero-pad input (features -> 128 lanes, batch -> tile multiple) outside
    # the kernel; slice back outside.  Padded rows/cols contribute zeros only.
    x_pad = jnp.zeros((B_pad, K_pad), jnp.float32).at[:B, :n_features].set(x)

    grid = (B_pad // tile_b,)

    def _const_spec(a):
        # Whole-array block, constant block index -> DMA'd once, VMEM-resident.
        return pl.BlockSpec(a.shape, lambda i: (0, 0))

    weight_args = tuple(params[k] for k in _PARAM_ORDER)

    flops = 2 * B_pad * sum(
        params[k].shape[0] * params[k].shape[1] for k in ("w1", "w2", "w3", "w4"))
    bytes_accessed = 4 * (x_pad.size + B_pad * O_pad
                          + sum(a.size for a in weight_args))

    out = pl.pallas_call(
        _autoencoder_kernel,
        out_shape=jax.ShapeDtypeStruct((B_pad, O_pad), jnp.float32),
        grid_spec=pltpu.PrefetchScalarGridSpec(
            num_scalar_prefetch=0,
            grid=grid,
            in_specs=[pl.BlockSpec((tile_b, K_pad), lambda i: (i, 0))]
                     + [_const_spec(a) for a in weight_args],
            out_specs=pl.BlockSpec((tile_b, O_pad), lambda i: (i, 0)),
        ),
        compiler_params=pltpu.CompilerParams(
            dimension_semantics=("parallel",)),
        cost_estimate=pl.CostEstimate(
            flops=flops, transcendentals=0, bytes_accessed=bytes_accessed),
    )(x_pad, *weight_args)

    return out[:B, :n_features]


# --------------------------- parameter creation -----------------------------
def _make_linear_weight(key, n_in, n_out):
    # PyTorch nn.Linear default: U(-1/sqrt(n_in), 1/sqrt(n_in)); stored [in, out].
    bound = 1.0 / jnp.sqrt(jnp.float32(max(n_in, 1)))
    return jax.random.uniform(key, (n_in, n_out), jnp.float32, -bound, bound)


def _make_bn_affine(key, n_out, eps=1e-5):
    # Deterministic synthetic BatchNorm1d running state, folded to (scale, shift).
    k1, k2, k3, k4 = jax.random.split(key, 4)
    gamma = 1.0 + 0.1 * jax.random.normal(k1, (1, n_out), jnp.float32)
    beta = 0.1 * jax.random.normal(k2, (1, n_out), jnp.float32)
    running_mean = 0.1 * jax.random.normal(k3, (1, n_out), jnp.float32)
    running_var = 1.0 + 0.1 * jax.random.uniform(k4, (1, n_out), jnp.float32)
    scale = gamma / jnp.sqrt(running_var + eps)
    shift = beta - running_mean * scale
    return scale, shift


def _make_lin_bn_layer(key, n_in, n_out):
    """LinBnDrop(bn=True): Linear(no bias) -> act -> BN -> Dropout (eval)."""
    kw, kb = jax.random.split(key)
    w = _make_linear_weight(kw, n_in, n_out)
    scale, shift = _make_bn_affine(kb, n_out)
    return w, scale, shift


def _make_lin_bias_layer(key, n_in, n_out):
    """LinBnDrop(bn=False): Linear(with bias), no act, no BN."""
    kw, kb = jax.random.split(key)
    w = _make_linear_weight(kw, n_in, n_out)
    bound = 1.0 / jnp.sqrt(jnp.float32(max(n_in, 1)))
    bias = jax.random.uniform(kb, (1, n_out), jnp.float32, -bound, bound)
    return w, bias


def init_autoencoder_params(key, nfeatures_rna, nfeatures_pro,
                            hidden_rna, hidden_pro, z_dim):
    hidden_rna = 0 if nfeatures_rna == 0 else hidden_rna
    hidden_pro = 0 if nfeatures_pro == 0 else hidden_pro
    hidden = hidden_rna + hidden_pro
    n_features = nfeatures_rna + nfeatures_pro

    keys = jax.random.split(key, 5)
    w_rna, s_rna, t_rna = _make_lin_bn_layer(keys[0], nfeatures_rna, hidden_rna)
    w_pro, s_pro, t_pro = _make_lin_bn_layer(keys[1], nfeatures_pro, hidden_pro)
    w_enc, s_enc, t_enc = _make_lin_bn_layer(keys[2], hidden, z_dim)
    w_de1, s_de1, t_de1 = _make_lin_bn_layer(keys[3], z_dim, hidden)
    w_de2, b_de2 = _make_lin_bias_layer(keys[4], hidden, n_features)

    # Lane-padded dims (multiples of 128).
    K_pad = _round_up(n_features, LANE)
    H_pad = _round_up(hidden, LANE)
    Z_pad = _round_up(z_dim, LANE)
    O_pad = _round_up(n_features, LANE)

    def pad2(a, rows, cols):
        out = jnp.zeros((rows, cols), jnp.float32)
        return out.at[:a.shape[0], :a.shape[1]].set(a)

    # Block-diagonal first layer:  x @ blockdiag(W_rna, W_pro)
    # (subsumes the x[:, :nf_rna] / x[:, nf_rna:] split + concat).
    w1 = jnp.zeros((K_pad, H_pad), jnp.float32)
    w1 = w1.at[:nfeatures_rna, :hidden_rna].set(w_rna)
    w1 = w1.at[nfeatures_rna:n_features, hidden_rna:hidden].set(w_pro)
    s1 = (jnp.zeros((1, H_pad), jnp.float32)
          .at[:, :hidden_rna].set(s_rna).at[:, hidden_rna:hidden].set(s_pro))
    t1 = (jnp.zeros((1, H_pad), jnp.float32)
          .at[:, :hidden_rna].set(t_rna).at[:, hidden_rna:hidden].set(t_pro))

    params = {
        "n_features": n_features,
        "nf_rna": nfeatures_rna,
        # padded, fused-kernel parameters (zero padding keeps padded columns 0)
        "w1": w1, "s1": s1, "t1": t1,
        "w2": pad2(w_enc, H_pad, Z_pad), "s2": pad2(s_enc, 1, Z_pad), "t2": pad2(t_enc, 1, Z_pad),
        "w3": pad2(w_de1, Z_pad, H_pad), "s3": pad2(s_de1, 1, H_pad), "t3": pad2(t_de1, 1, H_pad),
        "w4": pad2(w_de2, H_pad, O_pad), "b4": pad2(b_de2, 1, O_pad),
        # unpadded copies for the pure-JAX reference
        "ref": {
            "enc_rna": (w_rna, s_rna, t_rna),
            "enc_pro": (w_pro, s_pro, t_pro),
            "enc": (w_enc, s_enc, t_enc),
            "dec1": (w_de1, s_de1, t_de1),
            "dec2": (w_de2, jnp.ones((1, n_features), jnp.float32), b_de2),
        },
    }
    return params


# --------------------------- pure-JAX reference -----------------------------
def _ref_dense(x, w, scale, shift, leaky):
    h = x @ w
    if leaky:
        h = jnp.where(h >= 0.0, h, NEG_SLOPE * h)
    return h * scale + shift


def autoencoder_ref(x, params):
    r = params["ref"]
    nf_rna = params["nf_rna"]
    x_rna = _ref_dense(x[:, :nf_rna], *r["enc_rna"], True)
    x_pro = _ref_dense(x[:, nf_rna:], *r["enc_pro"], True)
    h = jnp.concatenate([x_rna, x_pro], axis=1)
    z = _ref_dense(h, *r["enc"], True)
    h2 = _ref_dense(z, *r["dec1"], True)
    return _ref_dense(h2, *r["dec2"], False)


if __name__ == "__main__":
    # Small, forward-consistent shapes (single-cell multiomics style).
    batch = 8
    nfeatures_rna, nfeatures_pro = 32, 16
    hidden_rna, hidden_pro = 24, 16
    z_dim = 10

    key = jax.random.PRNGKey(0)
    k_params, k_x = jax.random.split(key)
    params = init_autoencoder_params(k_params, nfeatures_rna, nfeatures_pro,
                                     hidden_rna, hidden_pro, z_dim)
    x = jax.random.normal(k_x, (batch, nfeatures_rna + nfeatures_pro),
                          jnp.float32)

    out = autoencoder_forward(x, params)
    out = jax.block_until_ready(out)

    ref = autoencoder_ref(x, params)
    assert out.shape == (batch, nfeatures_rna + nfeatures_pro)
    err = float(jnp.max(jnp.abs(out - ref)))
    assert jnp.allclose(out, ref, atol=1e-3, rtol=1e-3), err

    print("KERNEL_OK")
</pallas_src>

<mosaic_0001>
module attributes {stable_mosaic.version = 11 : i64} {
  func.func @_autoencoder_kernel(%arg0: i32, %arg1: memref<8x128xf32, #tpu.memory_space<vmem>>, %arg2: memref<128x128xf32, #tpu.memory_space<vmem>>, %arg3: memref<1x128xf32, #tpu.memory_space<vmem>>, %arg4: memref<1x128xf32, #tpu.memory_space<vmem>>, %arg5: memref<128x128xf32, #tpu.memory_space<vmem>>, %arg6: memref<1x128xf32, #tpu.memory_space<vmem>>, %arg7: memref<1x128xf32, #tpu.memory_space<vmem>>, %arg8: memref<128x128xf32, #tpu.memory_space<vmem>>, %arg9: memref<1x128xf32, #tpu.memory_space<vmem>>, %arg10: memref<1x128xf32, #tpu.memory_space<vmem>>, %arg11: memref<128x128xf32, #tpu.memory_space<vmem>>, %arg12: memref<1x128xf32, #tpu.memory_space<vmem>>, %arg13: memref<8x128xf32, #tpu.memory_space<vmem>>) attributes {dimension_semantics = [#tpu.dimension_semantics<parallel>], iteration_bounds = array<i64: 1>, scalar_prefetch = 0 : i64, scratch_operands = 0 : i64, tpu.core_type = #tpu.core_type<tc>, window_params = [{transform_indices = @transform_0, window_bounds = array<i64: 8, 128>}, {pipeline_mode = #tpu.pipeline_mode<synchronous>, transform_indices = @transform_1, window_bounds = array<i64: 128, 128>}, {pipeline_mode = #tpu.pipeline_mode<synchronous>, transform_indices = @transform_2, window_bounds = array<i64: 1, 128>}, {pipeline_mode = #tpu.pipeline_mode<synchronous>, transform_indices = @transform_3, window_bounds = array<i64: 1, 128>}, {pipeline_mode = #tpu.pipeline_mode<synchronous>, transform_indices = @transform_4, window_bounds = array<i64: 128, 128>}, {pipeline_mode = #tpu.pipeline_mode<synchronous>, transform_indices = @transform_5, window_bounds = array<i64: 1, 128>}, {pipeline_mode = #tpu.pipeline_mode<synchronous>, transform_indices = @transform_6, window_bounds = array<i64: 1, 128>}, {pipeline_mode = #tpu.pipeline_mode<synchronous>, transform_indices = @transform_7, window_bounds = array<i64: 128, 128>}, {pipeline_mode = #tpu.pipeline_mode<synchronous>, transform_indices = @transform_8, window_bounds = array<i64: 1, 128>}, {pipeline_mode = #tpu.pipeline_mode<synchronous>, transform_indices = @transform_9, window_bounds = array<i64: 1, 128>}, {pipeline_mode = #tpu.pipeline_mode<synchronous>, transform_indices = @transform_10, window_bounds = array<i64: 128, 128>}, {pipeline_mode = #tpu.pipeline_mode<synchronous>, transform_indices = @transform_11, window_bounds = array<i64: 1, 128>}, {transform_indices = @transform_12, window_bounds = array<i64: 8, 128>}]} {
    %c0 = arith.constant 0 : index
    %c0_0 = arith.constant 0 : index
    %0 = vector.load %arg1[%c0, %c0_0] : memref<8x128xf32, #tpu.memory_space<vmem>>, vector<8x128xf32>
    %c0_1 = arith.constant 0 : index
    %c0_2 = arith.constant 0 : index
    %1 = vector.load %arg2[%c0_1, %c0_2] : memref<128x128xf32, #tpu.memory_space<vmem>>, vector<128x128xf32>
    %cst = arith.constant dense<0.000000e+00> : vector<8x128xf32>
    %2 = tpu.matmul %0, %1, %cst {dimension_numbers = #tpu.dot_dimension_numbers<[1], [0], [0], [1], [0, 0, 1, 1], [], []>} : vector<8x128xf32>, vector<128x128xf32>, vector<8x128xf32> -> vector<8x128xf32>
    %cst_3 = arith.constant 0.000000e+00 : f32
    %3 = vector.broadcast %cst_3 : f32 to vector<8x128xf32>
    %4 = arith.cmpf oge, %2, %3 : vector<8x128xf32>
    %cst_4 = arith.constant 0.00999999977 : f32
    %5 = vector.broadcast %cst_4 : f32 to vector<8x128xf32>
    %6 = arith.mulf %5, %2 : vector<8x128xf32>
    %7 = arith.select %4, %2, %6 : vector<8x128xi1>, vector<8x128xf32>
    %c0_5 = arith.constant 0 : index
    %c0_6 = arith.constant 0 : index
    %8 = vector.load %arg3[%c0_5, %c0_6] : memref<1x128xf32, #tpu.memory_space<vmem>>, vector<1x128xf32>
    %9 = vector.broadcast %8 : vector<1x128xf32> to vector<8x128xf32>
    %10 = arith.mulf %7, %9 : vector<8x128xf32>
    %c0_7 = arith.constant 0 : index
    %c0_8 = arith.constant 0 : index
    %11 = vector.load %arg4[%c0_7, %c0_8] : memref<1x128xf32, #tpu.memory_space<vmem>>, vector<1x128xf32>
    %12 = vector.broadcast %11 : vector<1x128xf32> to vector<8x128xf32>
    %13 = arith.addf %10, %12 : vector<8x128xf32>
    %c0_9 = arith.constant 0 : index
    %c0_10 = arith.constant 0 : index
    %14 = vector.load %arg5[%c0_9, %c0_10] : memref<128x128xf32, #tpu.memory_space<vmem>>, vector<128x128xf32>
    %cst_11 = arith.constant dense<0.000000e+00> : vector<8x128xf32>
    %15 = tpu.matmul %13, %14, %cst_11 {dimension_numbers = #tpu.dot_dimension_numbers<[1], [0], [0], [1], [0, 0, 1, 1], [], []>} : vector<8x128xf32>, vector<128x128xf32>, vector<8x128xf32> -> vector<8x128xf32>
    %cst_12 = arith.constant 0.000000e+00 : f32
    %16 = vector.broadcast %cst_12 : f32 to vector<8x128xf32>
    %17 = arith.cmpf oge, %15, %16 : vector<8x128xf32>
    %cst_13 = arith.constant 0.00999999977 : f32
    %18 = vector.broadcast %cst_13 : f32 to vector<8x128xf32>
    %19 = arith.mulf %18, %15 : vector<8x128xf32>
    %20 = arith.select %17, %15, %19 : vector<8x128xi1>, vector<8x128xf32>
    %c0_14 = arith.constant 0 : index
    %c0_15 = arith.constant 0 : index
    %21 = vector.load %arg6[%c0_14, %c0_15] : memref<1x128xf32, #tpu.memory_space<vmem>>, vector<1x128xf32>
    %22 = vector.broadcast %21 : vector<1x128xf32> to vector<8x128xf32>
    %23 = arith.mulf %20, %22 : vector<8x128xf32>
    %c0_16 = arith.constant 0 : index
    %c0_17 = arith.constant 0 : index
    %24 = vector.load %arg7[%c0_16, %c0_17] : memref<1x128xf32, #tpu.memory_space<vmem>>, vector<1x128xf32>
    %25 = vector.broadcast %24 : vector<1x128xf32> to vector<8x128xf32>
    %26 = arith.addf %23, %25 : vector<8x128xf32>
    %c0_18 = arith.constant 0 : index
    %c0_19 = arith.constant 0 : index
    %27 = vector.load %arg8[%c0_18, %c0_19] : memref<128x128xf32, #tpu.memory_space<vmem>>, vector<128x128xf32>
    %cst_20 = arith.constant dense<0.000000e+00> : vector<8x128xf32>
    %28 = tpu.matmul %26, %27, %cst_20 {dimension_numbers = #tpu.dot_dimension_numbers<[1], [0], [0], [1], [0, 0, 1, 1], [], []>} : vector<8x128xf32>, vector<128x128xf32>, vector<8x128xf32> -> vector<8x128xf32>
    %cst_21 = arith.constant 0.000000e+00 : f32
    %29 = vector.broadcast %cst_21 : f32 to vector<8x128xf32>
    %30 = arith.cmpf oge, %28, %29 : vector<8x128xf32>
    %cst_22 = arith.constant 0.00999999977 : f32
    %31 = vector.broadcast %cst_22 : f32 to vector<8x128xf32>
    %32 = arith.mulf %31, %28 : vector<8x128xf32>
    %33 = arith.select %30, %28, %32 : vector<8x128xi1>, vector<8x128xf32>
    %c0_23 = arith.constant 0 : index
    %c0_24 = arith.constant 0 : index
    %34 = vector.load %arg9[%c0_23, %c0_24] : memref<1x128xf32, #tpu.memory_space<vmem>>, vector<1x128xf32>
    %35 = vector.broadcast %34 : vector<1x128xf32> to vector<8x128xf32>
    %36 = arith.mulf %33, %35 : vector<8x128xf32>
    %c0_25 = arith.constant 0 : index
    %c0_26 = arith.constant 0 : index
    %37 = vector.load %arg10[%c0_25, %c0_26] : memref<1x128xf32, #tpu.memory_space<vmem>>, vector<1x128xf32>
    %38 = vector.broadcast %37 : vector<1x128xf32> to vector<8x128xf32>
    %39 = arith.addf %36, %38 : vector<8x128xf32>
    %c0_27 = arith.constant 0 : index
    %c0_28 = arith.constant 0 : index
    %40 = vector.load %arg11[%c0_27, %c0_28] : memref<128x128xf32, #tpu.memory_space<vmem>>, vector<128x128xf32>
    %cst_29 = arith.constant dense<0.000000e+00> : vector<8x128xf32>
    %41 = tpu.matmul %39, %40, %cst_29 {dimension_numbers = #tpu.dot_dimension_numbers<[1], [0], [0], [1], [0, 0, 1, 1], [], []>} : vector<8x128xf32>, vector<128x128xf32>, vector<8x128xf32> -> vector<8x128xf32>
    %c0_30 = arith.constant 0 : index
    %c0_31 = arith.constant 0 : index
    %42 = vector.load %arg12[%c0_30, %c0_31] : memref<1x128xf32, #tpu.memory_space<vmem>>, vector<1x128xf32>
    %43 = vector.broadcast %42 : vector<1x128xf32> to vector<8x128xf32>
    %44 = arith.addf %41, %43 : vector<8x128xf32>
    %c0_32 = arith.constant 0 : index
    %c0_33 = arith.constant 0 : index
    %45 = vector.load %arg13[%c0_32, %c0_33] : memref<8x128xf32, #tpu.memory_space<vmem>>, vector<8x128xf32>
    tpu.vector_store %arg13[%c0_32, %c0_33], %44 {strides = array<i32>} : memref<8x128xf32, #tpu.memory_space<vmem>>, vector<8x128xf32>,
    return
  }
  func.func @transform_0(%arg0: i32) -> (i32, i32) {
    %c0_i32 = arith.constant 0 : i32
    %c0_i32_0 = arith.constant 0 : i32
    return %arg0, %c0_i32 : i32, i32
  }
  func.func @transform_1(%arg0: i32) -> (i32, i32) {
    %c0_i32 = arith.constant 0 : i32
    %c0_i32_0 = arith.constant 0 : i32
    %c0_i32_1 = arith.constant 0 : i32
    return %c0_i32, %c0_i32_0 : i32, i32
  }
  func.func @transform_2(%arg0: i32) -> (i32, i32) {
    %c0_i32 = arith.constant 0 : i32
    %c0_i32_0 = arith.constant 0 : i32
    %c0_i32_1 = arith.constant 0 : i32
    return %c0_i32, %c0_i32_0 : i32, i32
  }
  func.func @transform_3(%arg0: i32) -> (i32, i32) {
    %c0_i32 = arith.constant 0 : i32
    %c0_i32_0 = arith.constant 0 : i32
    %c0_i32_1 = arith.constant 0 : i32
    return %c0_i32, %c0_i32_0 : i32, i32
  }
  func.func @transform_4(%arg0: i32) -> (i32, i32) {
    %c0_i32 = arith.constant 0 : i32
    %c0_i32_0 = arith.constant 0 : i32
    %c0_i32_1 = arith.constant 0 : i32
    return %c0_i32, %c0_i32_0 : i32, i32
  }
  func.func @transform_5(%arg0: i32) -> (i32, i32) {
    %c0_i32 = arith.constant 0 : i32
    %c0_i32_0 = arith.constant 0 : i32
    %c0_i32_1 = arith.constant 0 : i32
    return %c0_i32, %c0_i32_0 : i32, i32
  }
  func.func @transform_6(%arg0: i32) -> (i32, i32) {
    %c0_i32 = arith.constant 0 : i32
    %c0_i32_0 = arith.constant 0 : i32
    %c0_i32_1 = arith.constant 0 : i32
    return %c0_i32, %c0_i32_0 : i32, i32
  }
  func.func @transform_7(%arg0: i32) -> (i32, i32) {
    %c0_i32 = arith.constant 0 : i32
    %c0_i32_0 = arith.constant 0 : i32
    %c0_i32_1 = arith.constant 0 : i32
    return %c0_i32, %c0_i32_0 : i32, i32
  }
  func.func @transform_8(%arg0: i32) -> (i32, i32) {
    %c0_i32 = arith.constant 0 : i32
    %c0_i32_0 = arith.constant 0 : i32
    %c0_i32_1 = arith.constant 0 : i32
    return %c0_i32, %c0_i32_0 : i32, i32
  }
  func.func @transform_9(%arg0: i32) -> (i32, i32) {
    %c0_i32 = arith.constant 0 : i32
    %c0_i32_0 = arith.constant 0 : i32
    %c0_i32_1 = arith.constant 0 : i32
    return %c0_i32, %c0_i32_0 : i32, i32
  }
  func.func @transform_10(%arg0: i32) -> (i32, i32) {
    %c0_i32 = arith.constant 0 : i32
    %c0_i32_0 = arith.constant 0 : i32
    %c0_i32_1 = arith.constant 0 : i32
    return %c0_i32, %c0_i32_0 : i32, i32
  }
  func.func @transform_11(%arg0: i32) -> (i32, i32) {
    %c0_i32 = arith.constant 0 : i32
    %c0_i32_0 = arith.constant 0 : i32
    %c0_i32_1 = arith.constant 0 : i32
    return %c0_i32, %c0_i32_0 : i32, i32
  }
  func.func @transform_12(%arg0: i32) -> (i32, i32) {
    %c0_i32 = arith.constant 0 : i32
    %c0_i32_0 = arith.constant 0 : i32
    return %arg0, %c0_i32 : i32, i32
  }
}

</mosaic_0001>

<bundles_post_ra>
// kernel: tpu_custom_call.1
= control target key start
LH: loop header
LB: loop body
LE: loop exit
PB: predicated region body
PF: predicated region fallthrough
CT: control target
= control target key end

     0   :  { %17 = vsyncpa [#allocation3], 0  ;;  %s605_s0 = inlined_call_operand.hbm [shape: f32[8,128], index: 0, kind: input, shape index: {}]   ;;  %s606_s1 = inlined_call_operand.hbm [shape: f32[128,128], index: 1, kind: input, shape index: {}]   ;;  %s607_s2 = inlined_call_operand.vmem [shape: f32[1,128], index: 2, kind: input, shape index: {}]   ;;  %s608_s3 = inlined_call_operand.vmem [shape: f32[1,128], index: 3, kind: input, shape index: {}]   ;;  %s609_s4 = inlined_call_operand.hbm [shape: f32[128,128], index: 4, kind: input, shape index: {}]   ;;  %s610_s5 = inlined_call_operand.vmem [shape: f32[1,128], index: 5, kind: input, shape index: {}]   ;;  %s611_s6 = inlined_call_operand.vmem [shape: f32[1,128], index: 6, kind: input, shape index: {}]   ;;  %s612_s7 = inlined_call_operand.hbm [shape: f32[128,128], index: 7, kind: input, shape index: {}]   ;;  %s613_s8 = inlined_call_operand.vmem [shape: f32[1,128], index: 8, kind: input, shape index: {}]   ;;  %s614_s9 = inlined_call_operand.vmem [shape: f32[1,128], index: 9, kind: input, shape index: {}]   ;;  %s615_s10 = inlined_call_operand.hbm [shape: f32[128,128], index: 10, kind: input, shape index: {}]   ;;  %s616_s11 = inlined_call_operand.vmem [shape: f32[1,128], index: 11, kind: input, shape index: {}]   ;;  %s617_s12 = inlined_call_operand.hbm [shape: f32[8,128], index: 12, kind: output, shape index: {}]  }
   0x1   :  { %18 = vsyncpa [#allocation6], 0 }
   0x2   :  { %19 = vsyncpa [#allocation9], 0  ;;  %s36_s23 = sshll.u32 %s606_s1, 4  ;;  %s37_s23 = int_to_ptr.hbm [resolvable:$true] %s36_s23 }
   0x3   :  { %20 = vsyncpa [#allocation4], 0  ;;  %s493_s24 = smov [#allocation5]   ;;  %s70_s28 = sshll.u32 %s612_s7, 4  ;;  %s71_s28 = int_to_ptr.hbm [resolvable:$true] %s70_s28 }
   0x4   :  { %s38_s25 = sshll.u32 %s493_s24, 4  ;;  %s494_s29 = smov 128   ;;  %s39_s25 = int_to_ptr.vmem [resolvable:$true] %s38_s25 }
   0x5   :  { %s495_s30 = smov 8   ;;  %s496_s13 = smov [#allocation8]  }
   0x6   :  { %44 = dma.hbm_to_vmem [thread:$0]  %s37_s23, 2048, %s39_s25, [#allocation6], %s494_s29, %s494_s29, %s495_s30  }
   0x7   :  { %s72_s14 = sshll.u32 %s496_s13, 4  ;;  %s26_s17 = sshll.u32 %s605_s0, 4  ;;  %s73_s14 = int_to_ptr.vmem [resolvable:$true] %s72_s14  ;;  %s27_s17 = int_to_ptr.hbm [resolvable:$true] %s26_s17 }
   0x8   :  { %78 = dma.hbm_to_vmem [thread:$0]  %s71_s28, 2048, %s73_s14, [#allocation9], %s494_s29, %s494_s29, %s495_s30  }
   0x9   :  { %s53_s19 = sshll.u32 %s609_s4, 4  ;;  %s497_s20 = smov [#allocation2]   ;;  %s54_s19 = int_to_ptr.hbm [resolvable:$true] %s53_s19 }
   0xa   :  { %s28_s21 = sshll.u32 %s497_s20, 4  ;;  %s498_s7 = smov [#allocation7]   ;;  %s29_s21 = int_to_ptr.vmem [resolvable:$true] %s28_s21 }
   0xb   :  { %31 = dma.hbm_to_vmem [thread:$0]  %s27_s17, 128, %s29_s21, [#allocation3]  }
   0xc   :  { %s55_s22 = sshll.u32 %s498_s7, 4  ;;  %s87_s25 = sshll.u32 %s615_s10, 4  ;;  %s56_s22 = int_to_ptr.vmem [resolvable:$true] %s55_s22  ;;  %s88_s25 = int_to_ptr.hbm [resolvable:$true] %s87_s25 }
   0xd   :  { %61 = dma.hbm_to_vmem [thread:$0]  %s54_s19, 2048, %s56_s22, [#allocation6], %s494_s29, %s494_s29, %s495_s30  }
   0xe   :  { %s499_s0 = smov [#allocation10]  }
   0xf   :  { %s89_s26 = sshll.u32 %s499_s0, 4  ;;  %s90_s26 = int_to_ptr.vmem [resolvable:$true] %s89_s26 }
  0x10   :  { %95 = dma.hbm_to_vmem [thread:$0]  %s88_s25, 2048, %s90_s26, [#allocation9], %s494_s29, %s494_s29, %s495_s30  }
  0x11   :  { %485 = dma.done.wait [#allocation3], 128  }
  0x12   :  { %486 = vsyncadd [#allocation3], 4294967168 }
  0x13   :  { %487 = dma.done.wait [#allocation6], 4096  }
  0x14   :  { %488 = vsyncadd [#allocation6], 4294963200 }
  0x15   :  { %489 = dma.done.wait [#allocation9], 4096  }
  0x16   :  { %490 = vsyncadd [#allocation9], 4294963200  ;;  %v134_v0 = vld [vmem:[#allocation5 + $0x78] sm:$0xff]  ;;  %v133_v1 = vld [vmem:[#allocation5 + $0x70] sm:$0xff]  ;;  %s500_s17 = smov [#allocation11]  }
  0x17   :  { %135 = vmatpush.msra.mxu0 %v134_v0  ;;  %v132_v2 = vld [vmem:[#allocation5 + $0x68] sm:$0xff]  ;;  %v131_v3 = vld [vmem:[#allocation5 + $0x60] sm:$0xff]  ;;  %v183_v4 = vld [vmem:[#allocation7 + $0x78] sm:$0xff]  ;;  %s312_s1 = sshll.u32 %s500_s17, 4  ;;  %s313_s1 = int_to_ptr.vmem [resolvable:$true] %s312_s1 }
  0x18   :  { %v130_v5 = vld [vmem:[#allocation5 + $0x58] sm:$0xff]  ;;  %184 = vmatpush.msra.mxu1 %v183_v4  ;;  %v182_v6 = vld [vmem:[#allocation7 + $0x70] sm:$0xff]  ;;  %v181_v7 = vld [vmem:[#allocation7 + $0x68] sm:$0xff] }
  0x19   :  { %136 = vmatpush.msra.mxu0 %v133_v1  ;;  %v129_v8 = vld [vmem:[#allocation5 + $0x50] sm:$0xff]  ;;  %v128_v9 = vld [vmem:[#allocation5 + $0x48] sm:$0xff]  ;;  %v180_v10 = vld [vmem:[#allocation7 + $0x60] sm:$0xff] }
  0x1a   :  { %185 = vmatpush.msra.mxu1 %v182_v6  ;;  %v179_v11 = vld [vmem:[#allocation7 + $0x58] sm:$0xff]  ;;  %v127_v12 = vld [vmem:[#allocation5 + $0x40] sm:$0xff]  ;;  %v178_v13 = vld [vmem:[#allocation7 + $0x50] sm:$0xff] }
  0x1b   :  { %137 = vmatpush.msra.mxu0 %v132_v2  ;;  %v126_v14 = vld [vmem:[#allocation5 + $0x38] sm:$0xff]  ;;  %v177_v15 = vld [vmem:[#allocation7 + $0x48] sm:$0xff]  ;;  %v125_v16 = vld [vmem:[#allocation5 + $0x30] sm:$0xff] }
  0x1c   :  { %186 = vmatpush.msra.mxu1 %v181_v7  ;;  %v176_v17 = vld [vmem:[#allocation7 + $0x40] sm:$0xff]  ;;  %v124_v18 = vld [vmem:[#allocation5 + $0x28] sm:$0xff]  ;;  %v175_v19 = vld [vmem:[#allocation7 + $0x38] sm:$0xff] }
  0x1d   :  { %138 = vmatpush.msra.mxu0 %v131_v3  ;;  %v123_v20 = vld [vmem:[#allocation5 + $0x20] sm:$0xff]  ;;  %v174_v21 = vld [vmem:[#allocation7 + $0x30] sm:$0xff]  ;;  %v122_v22 = vld [vmem:[#allocation5 + $0x18] sm:$0xff] }
  0x1e   :  { %187 = vmatpush.msra.mxu1 %v180_v10  ;;  %v173_v23 = vld [vmem:[#allocation7 + $0x28] sm:$0xff]  ;;  %v121_v24 = vld [vmem:[#allocation5 + $0x10] sm:$0xff]  ;;  %v172_v25 = vld [vmem:[#allocation7 + $0x20] sm:$0xff] }
  0x1f   :  { %139 = vmatpush.msra.mxu0 %v130_v5  ;;  %v120_v26 = vld [vmem:[#allocation5 + $0x8] sm:$0xff]  ;;  %v119_v27 = vld [vmem:[#allocation5] sm:$0xff]  ;;  %v118_v28 = vld [vmem:[#allocation2] sm:$0xff] }
  0x20   :  { %188 = vmatpush.msra.mxu1 %v179_v11  ;;  %v171_v29 = vld [vmem:[#allocation7 + $0x18] sm:$0xff]  ;;  %v170_v30 = vld [vmem:[#allocation7 + $0x10] sm:$0xff]  ;;  %v169_v31 = vld [vmem:[#allocation7 + $0x8] sm:$0xff] }
  0x21   :  { %140 = vmatpush.msra.mxu0 %v129_v8  ;;  %v168_v32 = vld [vmem:[#allocation7] sm:$0xff]  ;;  %v232_v33 = vld [vmem:[#allocation8 + $0x78] sm:$0xff]  ;;  %v231_v34 = vld [vmem:[#allocation8 + $0x70] sm:$0xff] }
  0x22   :  { %189 = vmatpush.msra.mxu1 %v178_v13  ;;  %233 = vmatpush.msra.mxu2 %v232_v33  ;;  %v230_v35 = vld [vmem:[#allocation8 + $0x68] sm:$0xff]  ;;  %v229_v36 = vld [vmem:[#allocation8 + $0x60] sm:$0xff]  ;;  %v228_v37 = vld [vmem:[#allocation8 + $0x58] sm:$0xff] }
  0x23   :  { %141 = vmatpush.msra.mxu0 %v128_v9  ;;  %v227_v38 = vld [vmem:[#allocation8 + $0x50] sm:$0xff]  ;;  %v226_v39 = vld [vmem:[#allocation8 + $0x48] sm:$0xff]  ;;  %v225_v40 = vld [vmem:[#allocation8 + $0x40] sm:$0xff] }
  0x24   :  { %190 = vmatpush.msra.mxu1 %v177_v15  ;;  %234 = vmatpush.msra.mxu2 %v231_v34  ;;  %v224_v41 = vld [vmem:[#allocation8 + $0x38] sm:$0xff]  ;;  %v223_v42 = vld [vmem:[#allocation8 + $0x30] sm:$0xff]  ;;  %v222_v43 = vld [vmem:[#allocation8 + $0x28] sm:$0xff] }
  0x25   :  { %142 = vmatpush.msra.mxu0 %v127_v12  ;;  %v221_v44 = vld [vmem:[#allocation8 + $0x20] sm:$0xff]  ;;  %v334_v46 = vld [vmem:[%s607_s2] ss:$0 sm:$0xff]  ;;  %v219_v53 = vld [vmem:[#allocation8 + $0x10] sm:$0xff] }
  0x26   :  { %191 = vmatpush.msra.mxu1 %v176_v17  ;;  %235 = vmatpush.msra.mxu2 %v230_v35  ;;  %v335_v48 = vld [vmem:[%s608_s3] ss:$0 sm:$0xff]  ;;  %v218_v54 = vld [vmem:[#allocation8 + $0x8] sm:$0xff]  ;;  %v217_v55 = vld [vmem:[#allocation8] sm:$0xff] }
  0x27   :  { %143 = vmatpush.msra.mxu0 %v126_v14  ;;  %v220_v52 = vld [vmem:[#allocation8 + $0x18] sm:$0xff]  ;;  %v280_v57 = vld [vmem:[#allocation10 + $0x70] sm:$0xff]  ;;  %v279_v58 = vld [vmem:[#allocation10 + $0x68] sm:$0xff] }
  0x28   :  { %192 = vmatpush.msra.mxu1 %v175_v19  ;;  %236 = vmatpush.msra.mxu2 %v229_v36  ;;  %v281_v56 = vld [vmem:[#allocation10 + $0x78] sm:$0xff]  ;;  %v278_v59 = vld [vmem:[#allocation10 + $0x60] sm:$0xff]  ;;  %v276_v61 = vld [vmem:[#allocation10 + $0x50] sm:$0xff] }
  0x29   :  { %144 = vmatpush.msra.mxu0 %v125_v16  ;;  %286 = vmatpush.msra.mxu3 %v281_v56  ;;  %v277_v60 = vld [vmem:[#allocation10 + $0x58] sm:$0xff]  ;;  %v275_v62 = vld [vmem:[#allocation10 + $0x48] sm:$0xff]  ;;  %v274_v63 = vld [vmem:[#allocation10 + $0x40] sm:$0xff] }
  0x2a   :  { %193 = vmatpush.msra.mxu1 %v174_v21  ;;  %237 = vmatpush.msra.mxu2 %v228_v37  ;;  %v273_v0 = vld [vmem:[#allocation10 + $0x38] sm:$0xff]  ;;  %v272_v1 = vld [vmem:[#allocation10 + $0x30] sm:$0xff]  ;;  %v271_v2 = vld [vmem:[#allocation10 + $0x28] sm:$0xff] }
  0x2b   :  { %145 = vmatpush.msra.mxu0 %v124_v18  ;;  %287 = vmatpush.msra.mxu3 %v280_v57  ;;  %v270_v3 = vld [vmem:[#allocation10 + $0x20] sm:$0xff]  ;;  %v336_v5 = vld [vmem:[%s610_s5] ss:$0 sm:$0xff]  ;;  %v268_v12 = vld [vmem:[#allocation10 + $0x10] sm:$0xff] }
  0x2c   :  { %194 = vmatpush.msra.mxu1 %v173_v23  ;;  %238 = vmatpush.msra.mxu2 %v227_v38  ;;  %v337_v7 = vld [vmem:[%s611_s6] ss:$0 sm:$0xff]  ;;  %v267_v13 = vld [vmem:[#allocation10 + $0x8] sm:$0xff]  ;;  %v266_v14 = vld [vmem:[#allocation10] sm:$0xff] }
  0x2d   :  { %146 = vmatpush.msra.mxu0 %v123_v20  ;;  %288 = vmatpush.msra.mxu3 %v279_v58  ;;  %v269_v11 = vld [vmem:[#allocation10 + $0x18] sm:$0xff] }
  0x2e   :  { %195 = vmatpush.msra.mxu1 %v172_v25  ;;  %239 = vmatpush.msra.mxu2 %v226_v39  ;;  %v338_v16 = vld [vmem:[%s613_s8] ss:$0 sm:$0xff]  ;;  %s314_s8 = sshll.u32 %s617_s12, 4  ;;  %s315_s8 = int_to_ptr.hbm [resolvable:$true] %s314_s8 }
  0x2f   :  { %147 = vmatpush.msra.mxu0 %v122_v22  ;;  %289 = vmatpush.msra.mxu3 %v278_v59  ;;  %v339_v18 = vld [vmem:[%s614_s9] ss:$0 sm:$0xff] }
  0x30   :  { %196 = vmatpush.msra.mxu1 %v171_v29  ;;  %240 = vmatpush.msra.mxu2 %v225_v40  ;;  %v340_v22 = vld [vmem:[%s616_s11] ss:$0 sm:$0xff] }
  0x31   :  { %148 = vmatpush.msra.mxu0 %v121_v24  ;;  %290 = vmatpush.msra.mxu3 %v277_v60 }
  0x32   :  { %197 = vmatpush.msra.mxu1 %v170_v30  ;;  %241 = vmatpush.msra.mxu2 %v224_v41 }
  0x33   :  { %149 = vmatpush.msra.mxu0 %v120_v26  ;;  %291 = vmatpush.msra.mxu3 %v276_v61 }
  0x34   :  { %198 = vmatpush.msra.mxu1 %v169_v31  ;;  %242 = vmatpush.msra.mxu2 %v223_v42 }
  0x35   :  { %150 = vmatpush.msra.mxu0 %v119_v27  ;;  %292 = vmatpush.msra.mxu3 %v275_v62 }
  0x36   :  { %151 = vmatmul.f32.vlgmr.msra.gmra.mxu0 %v118_v28  ;;  %199 = vmatpush.msra.mxu1 %v168_v32 }
  0x37   :  { %243 = vmatpush.msra.mxu2 %v222_v43  ;;  %293 = vmatpush.msra.mxu3 %v274_v63 }
  0x39   :  { %244 = vmatpush.msra.mxu2 %v221_v44  ;;  %294 = vmatpush.msra.mxu3 %v273_v0 }
  0x3b   :  { %245 = vmatpush.msra.mxu2 %v220_v52  ;;  %295 = vmatpush.msra.mxu3 %v272_v1 }
  0x3d   :  { %246 = vmatpush.msra.mxu2 %v219_v53  ;;  %296 = vmatpush.msra.mxu3 %v271_v2 }
  0x3f   :  { %247 = vmatpush.msra.mxu2 %v218_v54  ;;  %297 = vmatpush.msra.mxu3 %v270_v3 }
  0x41   :  { %248 = vmatpush.msra.mxu2 %v217_v55  ;;  %298 = vmatpush.msra.mxu3 %v269_v11 }
  0x43   :  { %299 = vmatpush.msra.mxu3 %v268_v12 }
  0x45   :  { %300 = vmatpush.msra.mxu3 %v267_v13 }
  0x47   :  { %301 = vmatpush.msra.mxu3 %v266_v14 }
  0xb3   :  { %v152_v45 = vpop.f32.mrf.mxu0 }
  0xb4   :  { %vm155_vm0 = vcmp.ge.f32.partialorder %v152_v45, 0.0  ;;  %v156_v47 = vmul.f32 0.01, %v152_v45 }
  0xb6   :  { %v157_v49 = vsel %vm155_vm0, %v152_v45, %v156_v47 }
  0xb7   :  { %v162_v50 = vmul.f32 %v334_v46, %v157_v49 }
  0xb9   :  { %v167_v51 = vadd.f32 %v335_v48, %v162_v50 }
  0xbb   :  { %200 = vmatmul.f32.vlgmr.msra.gmra.mxu1 %v167_v51 }
 0x138   :  { %v201_v4 = vpop.f32.mrf.mxu1 }
 0x139   :  { %vm204_vm1 = vcmp.ge.f32.partialorder %v201_v4, 0.0  ;;  %v205_v6 = vmul.f32 0.01, %v201_v4 }
 0x13b   :  { %v206_v8 = vsel %vm204_vm1, %v201_v4, %v205_v6 }
 0x13c   :  { %v211_v9 = vmul.f32 %v336_v5, %v206_v8 }
 0x13e   :  { %v216_v10 = vadd.f32 %v337_v7, %v211_v9 }
 0x140   :  { %249 = vmatmul.f32.vlgmr.msra.gmra.mxu2 %v216_v10 }
 0x1c3   :  { %v250_v15 = vpop.f32.mrf.mxu2 }
 0x1c4   :  { %vm253_vm2 = vcmp.ge.f32.partialorder %v250_v15, 0.0  ;;  %v254_v17 = vmul.f32 0.01, %v250_v15 }
 0x1c6   :  { %v255_v19 = vsel %vm253_vm2, %v250_v15, %v254_v17 }
 0x1c7   :  { %v260_v20 = vmul.f32 %v338_v16, %v255_v19 }
 0x1c9   :  { %v265_v21 = vadd.f32 %v339_v18, %v260_v20 }
 0x1cb   :  { %302 = vmatmul.f32.vlgmr.msra.gmra.mxu3 %v265_v21 }
 0x24e   :  { %v303_v23 = vpop.f32.mrf.mxu3 }
 0x24f   :  { %v304_v24 = vadd.f32 %v340_v22, %v303_v23 }
 0x251   :  { %306 = vst [vmem:[#allocation11] sm:$0xff] %v304_v24 }
 0x252   :  { %317 = dma.vmem_to_hbm [thread:$0]  %s313_s1, 128, %s315_s8, [#allocation4]  }
 0x253   :  { %491 = dma.done.wait [#allocation4], 128  }
 0x254   :  { %492 = vsyncadd [#allocation4], 4294967168 }
 0x255   :  { %322 = vsyncpa [#allocation3], 1 }
 0x256   :  { %323 = vsyncpa [#allocation6], 1 }
 0x257   :  { %324 = vsyncpa [#allocation9], 1 }
 0x258   :  { %325 = vsyncpa [#allocation4], 1 }

</bundles_post_ra>
